<compile_context>
chip_gen: v7x
topology: tpu7x:2x2x1
jax: 0.10.0
libtpu: 0.0.40
codegen_flags: <defaults>
</compile_context>

<pallas_src>
import functools

import jax
import jax.numpy as jnp
from jax.experimental import pallas as pl
from jax.experimental.pallas import tpu as pltpu


def _maxpool2d_kernel(x_ref, o_ref, hbuf_ref, *, k, s, p, pad_val):
    """One lane-block tile.

    x_ref:    (H,    W,        Lb)  input tile,     layout (H, W, N*C)
    o_ref:    (Hout, Wout,     Lb)  pooled output tile
    hbuf_ref: (Hout, W + 2p,   Lb)  height-reduced, W-padded intermediate
    """
    H, W, Lb = x_ref.shape
    Hout, Wout, _ = o_ref.shape
    Wp = W + 2 * p
    dtype = x_ref.dtype

    # ---- Pass 1: sliding max over the H window (leading dim => pure offsets).
    # Interior rows (window fully inside [0, H)): k strided leading-dim loads,
    # (k-1) element-wise maxima, one contiguous store.
    i_top = min(Hout, -(-p // s))                       # ceil(p / s)
    i_bot = i_top
    if H - k + p >= 0:
        i_bot = max(i_top, min(Hout, (H - k + p) // s + 1))
    n_mid = i_bot - i_top
    if n_mid > 0:
        start = i_top * s - p                           # >= 0 by construction
        acc = x_ref[pl.ds(start, n_mid, s), :, :]
        for di in range(1, k):
            acc = jnp.maximum(acc, x_ref[pl.ds(start + di, n_mid, s), :, :])
        hbuf_ref[i_top:i_bot, p:p + W, :] = acc

    # Edge rows whose window reaches into the implicit pad region: at most
    # ceil(p/s) per side (exactly 1 for NIN's p=1).  Max over valid rows only.
    for i in [i for i in range(Hout) if not (i_top <= i < i_bot)]:
        r_lo = max(0, i * s - p)
        r_hi = min(H, i * s - p + k)
        if r_hi <= r_lo:                                # all-pad window (can't
            hbuf_ref[i, p:p + W, :] = jnp.full((W, Lb), pad_val, dtype)  # occur
        else:                                           # for valid configs)
            row = x_ref[r_lo, :, :]
            for r in range(r_lo + 1, r_hi):
                row = jnp.maximum(row, x_ref[r, :, :])
            hbuf_ref[i, p:p + W, :] = row

    # W padding: fill only the 2p border columns of the height-reduced
    # intermediate — no full padded copy of the input tile.
    if p > 0:
        hbuf_ref[:, 0:p, :] = jnp.full((Hout, p, Lb), pad_val, dtype)
        hbuf_ref[:, p + W:Wp, :] = jnp.full((Hout, p, Lb), pad_val, dtype)

    # ---- Pass 2: sliding max over the W window (sublane dim), over only the
    # Hout already-reduced rows.  One full, lane-dense output store.
    out = hbuf_ref[:, pl.ds(0, Wout, s), :]
    for dj in range(1, k):
        out = jnp.maximum(out, hbuf_ref[:, pl.ds(dj, Wout, s), :])
    o_ref[...] = out


def qmaxpool2d(x_nchw, kernel_size=3, stride=2, padding=1):
    """Forward pass of QMaxPool2d (w=False). Input/output are NCHW."""
    N, C, H, W = x_nchw.shape
    k, s, p = kernel_size, stride, padding
    Hout = (H + 2 * p - k) // s + 1
    Wout = (W + 2 * p - k) // s + 1
    Wp = W + 2 * p
    dtype = x_nchw.dtype
    itemsize = jnp.dtype(dtype).itemsize

    # Padding value: -inf for floats; dtype minimum for quantized int inputs.
    if jnp.issubdtype(dtype, jnp.floating):
        pad_val = float("-inf")
    elif jnp.issubdtype(dtype, jnp.integer):
        pad_val = int(jnp.iinfo(dtype).min)
    else:
        raise ValueError(f"Unsupported dtype for max pooling: {dtype}")

    # NCHW -> (H, W, N*C): pooled axes off the lanes, N*C folded onto lanes.
    L = N * C
    x = jnp.transpose(x_nchw, (2, 3, 0, 1)).reshape(H, W, L)

    # Per-lane working set: double-buffered in/out blocks + single scratch.
    per_lane_bytes = (2 * H * W + 2 * Hout * Wout + Hout * Wp) * itemsize

    # Generation-aware per-step VMEM budget (v7x: 64 MiB, v5e/v6e: 128 MiB).
    try:
        vmem_cap = int(getattr(pltpu.get_tpu_info(), "vmem_capacity_bytes",
                               64 * 1024 * 1024))
    except Exception:
        vmem_cap = 64 * 1024 * 1024
    budget = min(int(vmem_cap * 0.4), 48 * 1024 * 1024)

    LANE = 128
    if L <= LANE:
        Lb = L                                  # tiny problems: one lane block
    else:
        # Largest 128-multiple that fits the budget, capped so the grid keeps
        # >= 2 'parallel' steps (v7x has 2 TensorCores sharded over them).
        fit_cap = max(LANE, (budget // per_lane_bytes) // LANE * LANE)
        half_cap = max(LANE, ((L + 1) // 2) // LANE * LANE)
        Lb = min(fit_cap, half_cap)
    grid = (pl.cdiv(L, Lb),)

    step_bytes = Lb * per_lane_bytes
    vmem_limit = None
    if int(step_bytes * 1.25) > 16 * 1024 * 1024:       # smallest default scoped limit (v5e)
        vmem_limit = min(vmem_cap, int(step_bytes * 1.25) + (1 << 20))

    kernel = functools.partial(_maxpool2d_kernel, k=k, s=s, p=p,
                               pad_val=pad_val)

    out_hwl = pl.pallas_call(
        kernel,
        out_shape=jax.ShapeDtypeStruct((Hout, Wout, L), dtype),
        grid_spec=pltpu.PrefetchScalarGridSpec(
            num_scalar_prefetch=0,
            grid=grid,
            in_specs=[pl.BlockSpec((H, W, Lb), lambda l: (0, 0, l))],
            out_specs=pl.BlockSpec((Hout, Wout, Lb), lambda l: (0, 0, l)),
            scratch_shapes=[pltpu.VMEM((Hout, Wp, Lb), dtype)],
        ),
        compiler_params=pltpu.CompilerParams(
            dimension_semantics=("parallel",),
            vmem_limit_bytes=vmem_limit,
        ),
        cost_estimate=pl.CostEstimate(
            flops=int(k * k * L * Hout * Wout),
            transcendentals=0,
            bytes_accessed=int((L * H * W + L * Hout * Wout) * itemsize)),
    )(x)

    # (Hout, Wout, N*C) -> NCHW to match the PyTorch output layout.
    return jnp.transpose(out_hwl.reshape(Hout, Wout, N, C), (2, 3, 0, 1))


def _torch_maxpool2d_ref(x, k, s, p):
    # nn.MaxPool2d(k, s, p) == reduce_window with -inf padding (ceil_mode=False).
    return jax.lax.reduce_window(
        x, -jnp.inf, jax.lax.max,
        window_dimensions=(1, 1, k, k),
        window_strides=(1, 1, s, s),
        padding=((0, 0), (0, 0), (p, p), (p, p)))


if __name__ == "__main__":
    key = jax.random.PRNGKey(0)
    k1, k2 = jax.random.split(key)

    # NIN-style pooling config: MaxPool2d(kernel_size=3, stride=2, padding=1).
    x1 = jax.random.normal(k1, (2, 4, 16, 16), dtype=jnp.float32)
    out1 = jax.block_until_ready(qmaxpool2d(x1, kernel_size=3, stride=2, padding=1))
    ref1 = _torch_maxpool2d_ref(x1, 3, 2, 1)
    assert out1.shape == ref1.shape, (out1.shape, ref1.shape)
    assert bool(jnp.allclose(out1, ref1)), "mismatch (k=3, s=2, p=1)"

    # No-padding path: MaxPool2d(kernel_size=2, stride=2, padding=0).
    x2 = jax.random.normal(k2, (2, 4, 16, 16), dtype=jnp.float32)
    out2 = jax.block_until_ready(qmaxpool2d(x2, kernel_size=2, stride=2, padding=0))
    ref2 = _torch_maxpool2d_ref(x2, 2, 2, 0)
    assert out2.shape == ref2.shape, (out2.shape, ref2.shape)
    assert bool(jnp.allclose(out2, ref2)), "mismatch (k=2, s=2, p=0)"

    print("KERNEL_OK")
</pallas_src>

<mosaic_0001>
module attributes {stable_mosaic.version = 11 : i64} {
  func.func @_maxpool2d_kernel(%arg0: i32, %arg1: memref<16x16x8xf32, #tpu.memory_space<vmem>>, %arg2: memref<8x8x8xf32, #tpu.memory_space<vmem>>, %arg3: memref<8x18x8xf32, #tpu.memory_space<vmem>>) attributes {dimension_semantics = [#tpu.dimension_semantics<parallel>], iteration_bounds = array<i64: 1>, scalar_prefetch = 0 : i64, scratch_operands = 1 : i64, tpu.core_type = #tpu.core_type<tc>, window_params = [{transform_indices = @transform_0, window_bounds = array<i64: 16, 16, 8>}, {transform_indices = @transform_1, window_bounds = array<i64: 8, 8, 8>}]} {
    %c1 = arith.constant 1 : index
    %c0 = arith.constant 0 : index
    %c0_0 = arith.constant 0 : index
    %0 = tpu.strided_load %arg1[%c1, %c0, %c0_0] {strides = array<i32: 2, 1, 1>} : memref<16x16x8xf32, #tpu.memory_space<vmem>>, vector<7x16x8xf32>
    %c2 = arith.constant 2 : index
    %c0_1 = arith.constant 0 : index
    %c0_2 = arith.constant 0 : index
    %1 = tpu.strided_load %arg1[%c2, %c0_1, %c0_2] {strides = array<i32: 2, 1, 1>} : memref<16x16x8xf32, #tpu.memory_space<vmem>>, vector<7x16x8xf32>
    %2 = arith.maximumf %0, %1 : vector<7x16x8xf32>
    %c3 = arith.constant 3 : index
    %c0_3 = arith.constant 0 : index
    %c0_4 = arith.constant 0 : index
    %3 = tpu.strided_load %arg1[%c3, %c0_3, %c0_4] {strides = array<i32: 2, 1, 1>} : memref<16x16x8xf32, #tpu.memory_space<vmem>>, vector<7x16x8xf32>
    %4 = arith.maximumf %2, %3 : vector<7x16x8xf32>
    %c1_5 = arith.constant 1 : index
    %c1_6 = arith.constant 1 : index
    %c0_7 = arith.constant 0 : index
    %5 = vector.load %arg3[%c1_5, %c1_6, %c0_7] : memref<8x18x8xf32, #tpu.memory_space<vmem>>, vector<7x16x8xf32>
    tpu.vector_store %arg3[%c1_5, %c1_6, %c0_7], %4 {strides = array<i32>} : memref<8x18x8xf32, #tpu.memory_space<vmem>>, vector<7x16x8xf32>,
    %c0_8 = arith.constant 0 : index
    %c0_9 = arith.constant 0 : index
    %c0_10 = arith.constant 0 : index
    %6 = vector.load %arg1[%c0_8, %c0_9, %c0_10] : memref<16x16x8xf32, #tpu.memory_space<vmem>>, vector<1x16x8xf32>
    %7 = vector.shape_cast %6 : vector<1x16x8xf32> to vector<16x8xf32>
    %c1_11 = arith.constant 1 : index
    %c0_12 = arith.constant 0 : index
    %c0_13 = arith.constant 0 : index
    %8 = vector.load %arg1[%c1_11, %c0_12, %c0_13] : memref<16x16x8xf32, #tpu.memory_space<vmem>>, vector<1x16x8xf32>
    %9 = vector.shape_cast %8 : vector<1x16x8xf32> to vector<16x8xf32>
    %10 = arith.maximumf %7, %9 : vector<16x8xf32>
    %c0_14 = arith.constant 0 : index
    %c1_15 = arith.constant 1 : index
    %c0_16 = arith.constant 0 : index
    %11 = vector.load %arg3[%c0_14, %c1_15, %c0_16] : memref<8x18x8xf32, #tpu.memory_space<vmem>>, vector<1x16x8xf32>
    %12 = vector.shape_cast %11 : vector<1x16x8xf32> to vector<16x8xf32>
    %13 = vector.shape_cast %10 : vector<16x8xf32> to vector<1x16x8xf32>
    tpu.vector_store %arg3[%c0_14, %c1_15, %c0_16], %13 {strides = array<i32>} : memref<8x18x8xf32, #tpu.memory_space<vmem>>, vector<1x16x8xf32>,
    %cst = arith.constant 0xFF800000 : f32
    %14 = vector.broadcast %cst : f32 to vector<8x1x8xf32>
    %c0_17 = arith.constant 0 : index
    %c0_18 = arith.constant 0 : index
    %c0_19 = arith.constant 0 : index
    %15 = vector.load %arg3[%c0_17, %c0_18, %c0_19] : memref<8x18x8xf32, #tpu.memory_space<vmem>>, vector<8x1x8xf32>
    tpu.vector_store %arg3[%c0_17, %c0_18, %c0_19], %14 {strides = array<i32>} : memref<8x18x8xf32, #tpu.memory_space<vmem>>, vector<8x1x8xf32>,
    %cst_20 = arith.constant 0xFF800000 : f32
    %16 = vector.broadcast %cst_20 : f32 to vector<8x1x8xf32>
    %c0_21 = arith.constant 0 : index
    %c17 = arith.constant 17 : index
    %c0_22 = arith.constant 0 : index
    %17 = vector.load %arg3[%c0_21, %c17, %c0_22] : memref<8x18x8xf32, #tpu.memory_space<vmem>>, vector<8x1x8xf32>
    tpu.vector_store %arg3[%c0_21, %c17, %c0_22], %16 {strides = array<i32>} : memref<8x18x8xf32, #tpu.memory_space<vmem>>, vector<8x1x8xf32>,
    %c0_23 = arith.constant 0 : index
    %c0_24 = arith.constant 0 : index
    %c0_25 = arith.constant 0 : index
    %18 = tpu.strided_load %arg3[%c0_23, %c0_24, %c0_25] {strides = array<i32: 1, 2, 1>} : memref<8x18x8xf32, #tpu.memory_space<vmem>>, vector<8x8x8xf32>
    %c0_26 = arith.constant 0 : index
    %c1_27 = arith.constant 1 : index
    %c0_28 = arith.constant 0 : index
    %19 = tpu.strided_load %arg3[%c0_26, %c1_27, %c0_28] {strides = array<i32: 1, 2, 1>} : memref<8x18x8xf32, #tpu.memory_space<vmem>>, vector<8x8x8xf32>
    %20 = arith.maximumf %18, %19 : vector<8x8x8xf32>
    %c0_29 = arith.constant 0 : index
    %c2_30 = arith.constant 2 : index
    %c0_31 = arith.constant 0 : index
    %21 = tpu.strided_load %arg3[%c0_29, %c2_30, %c0_31] {strides = array<i32: 1, 2, 1>} : memref<8x18x8xf32, #tpu.memory_space<vmem>>, vector<8x8x8xf32>
    %22 = arith.maximumf %20, %21 : vector<8x8x8xf32>
    %c0_32 = arith.constant 0 : index
    %c0_33 = arith.constant 0 : index
    %c0_34 = arith.constant 0 : index
    %23 = vector.load %arg2[%c0_32, %c0_33, %c0_34] : memref<8x8x8xf32, #tpu.memory_space<vmem>>, vector<8x8x8xf32>
    tpu.vector_store %arg2[%c0_32, %c0_33, %c0_34], %22 {strides = array<i32>} : memref<8x8x8xf32, #tpu.memory_space<vmem>>, vector<8x8x8xf32>,
    return
  }
  func.func @transform_0(%arg0: i32) -> (i32, i32, i32) {
    %c0_i32 = arith.constant 0 : i32
    %c0_i32_0 = arith.constant 0 : i32
    %c0_i32_1 = arith.constant 0 : i32
    return %c0_i32, %c0_i32_0, %arg0 : i32, i32, i32
  }
  func.func @transform_1(%arg0: i32) -> (i32, i32, i32) {
    %c0_i32 = arith.constant 0 : i32
    %c0_i32_0 = arith.constant 0 : i32
    %c0_i32_1 = arith.constant 0 : i32
    return %c0_i32, %c0_i32_0, %arg0 : i32, i32, i32
  }
}

</mosaic_0001>

<bundles_post_ra>
// kernel: tpu_custom_call.1
= control target key start
LH: loop header
LB: loop body
LE: loop exit
PB: predicated region body
PF: predicated region fallthrough
CT: control target
= control target key end

     0   :  { %vm83_vm0 = vcmask 64512   ;;  %vm106_vm1 = vcmask 57344   ;;  %v282_v5 = vmov -inf   ;;  %s428_s0 = inlined_call_operand.vmem [shape: f32[16,16,8], index: 0, kind: input, shape index: {}]   ;;  %s429_s1 = inlined_call_operand.hbm [shape: f32[8,8,8], index: 1, kind: output, shape index: {}]  }
   0x1   :  { %v98_v0 = vld [vmem:[%s428_s0] sm:$0xff]  ;;  %v252_v1 = vld [vmem:[%s428_s0 + $0x10] sm:$0xff]  ;;  %v99_v2 = vld [vmem:[%s428_s0 + $0x8] sm:$0xff]  ;;  %107 = vst.msk [vmem:[#allocation2] sm:$0x1] %vm106_vm1, %v282_v5 }
   0x2   :  { %v102_v3 = vmax.f32 %v98_v0, %v252_v1  ;;  %v253_v4 = vld [vmem:[%s428_s0 + $0x18] sm:$0xff]  ;;  %108 = vst.msk [vmem:[#allocation2 + $0x18] sm:$0x1] %vm106_vm1, %v282_v5  ;;  %109 = vst.msk [vmem:[#allocation2 + $0x30] sm:$0x1] %vm106_vm1, %v282_v5  ;;  %v224_v6 = vld [vmem:[%s428_s0 + $0x20] sm:$0xff] }
   0x3   :  { %110 = vst.msk [vmem:[#allocation2 + $0x48] sm:$0x1] %vm106_vm1, %v282_v5  ;;  %111 = vst.msk [vmem:[#allocation2 + $0x60] sm:$0x1] %vm106_vm1, %v282_v5  ;;  %v238_v7 = vld [vmem:[%s428_s0 + $0x30] sm:$0xff]  ;;  %v103_v8 = vmax.f32 %v99_v2, %v253_v4  ;;  %v39_v9 = vmax.f32 %v252_v1, %v224_v6  ;;  %v225_v10 = vld [vmem:[%s428_s0 + $0x28] sm:$0xff] }
   0x4   :  { %112 = vst.msk [vmem:[#allocation2 + $0x78] sm:$0x1] %vm106_vm1, %v282_v5  ;;  %113 = vst.msk [vmem:[#allocation2 + $0x90] sm:$0x1] %vm106_vm1, %v282_v5  ;;  %v239_v11 = vld [vmem:[%s428_s0 + $0x38] sm:$0xff]  ;;  %v226_v12 = vld [vmem:[%s428_s0 + $0x40] sm:$0xff]  ;;  %v40_v13 = vmax.f32 %v253_v4, %v225_v10 }
   0x5   :  { %114 = vst.msk [vmem:[#allocation2 + $0xa8] sm:$0x1] %vm106_vm1, %v282_v5  ;;  %v41_v14 = vmax.f32 %v238_v7, %v226_v12  ;;  %v240_v15 = vld [vmem:[%s428_s0 + $0x50] sm:$0xff]  ;;  %v227_v16 = vld [vmem:[%s428_s0 + $0x48] sm:$0xff]  ;;  %v241_v17 = vld [vmem:[%s428_s0 + $0x58] sm:$0xff]  ;;  %v68_v18 = vmax.f32 %v39_v9, %v238_v7 }
   0x6   :  { %104 = vst.msk [vmem:[#allocation2 + $0x1] sm:$0xff] %vm83_vm0, %v102_v3  ;;  %105 = vst.msk [vmem:[#allocation2 + $0x9] sm:$0xff] %vm83_vm0, %v103_v8  ;;  %v42_v19 = vmax.f32 %v239_v11, %v227_v16  ;;  %v228_v20 = vld [vmem:[%s428_s0 + $0x60] sm:$0xff]  ;;  %v242_v21 = vld [vmem:[%s428_s0 + $0x70] sm:$0xff]  ;;  %v69_v23 = vmax.f32 %v40_v13, %v239_v11 }
   0x7   :  { %v229_v22 = vld [vmem:[%s428_s0 + $0x68] sm:$0xff]  ;;  %v70_v24 = vmax.f32 %v41_v14, %v240_v15  ;;  %v43_v25 = vmax.f32 %v240_v15, %v228_v20  ;;  %v243_v27 = vld [vmem:[%s428_s0 + $0x78] sm:$0xff]  ;;  %v230_v28 = vld [vmem:[%s428_s0 + $0x80] sm:$0xff]  ;;  %84 = vst.msk [vmem:[#allocation2 + $0x19] sm:$0xff] %vm83_vm0, %v68_v18 }
   0x8   :  { %v44_v26 = vmax.f32 %v241_v17, %v229_v22  ;;  %v244_v29 = vld [vmem:[%s428_s0 + $0x90] sm:$0xff]  ;;  %v71_v30 = vmax.f32 %v42_v19, %v241_v17  ;;  %v45_v31 = vmax.f32 %v242_v21, %v230_v28  ;;  %v231_v32 = vld [vmem:[%s428_s0 + $0x88] sm:$0xff]  ;;  %v245_v33 = vld [vmem:[%s428_s0 + $0x98] sm:$0xff]  ;;  %85 = vst.msk [vmem:[#allocation2 + $0x21] sm:$0xff] %vm83_vm0, %v69_v23 }
   0x9   :  { %v232_v34 = vld [vmem:[%s428_s0 + $0xa0] sm:$0xff]  ;;  %86 = vst.msk [vmem:[#allocation2 + $0x31] sm:$0xff] %vm83_vm0, %v70_v24  ;;  %v72_v35 = vmax.f32 %v43_v25, %v242_v21  ;;  %v46_v37 = vmax.f32 %v243_v27, %v231_v32  ;;  %v246_v39 = vld [vmem:[%s428_s0 + $0xb0] sm:$0xff]  ;;  %v233_v40 = vld [vmem:[%s428_s0 + $0xa8] sm:$0xff] }
   0xa   :  { %v73_v36 = vmax.f32 %v44_v26, %v243_v27  ;;  %v47_v38 = vmax.f32 %v244_v29, %v232_v34  ;;  %v247_v41 = vld [vmem:[%s428_s0 + $0xb8] sm:$0xff]  ;;  %87 = vst.msk [vmem:[#allocation2 + $0x39] sm:$0xff] %vm83_vm0, %v71_v30  ;;  %v74_v42 = vmax.f32 %v45_v31, %v244_v29  ;;  %v48_v43 = vmax.f32 %v245_v33, %v233_v40  ;;  %v234_v44 = vld [vmem:[%s428_s0 + $0xc0] sm:$0xff]  ;;  %v248_v45 = vld [vmem:[%s428_s0 + $0xd0] sm:$0xff] }
   0xb   :  { %v235_v46 = vld [vmem:[%s428_s0 + $0xc8] sm:$0xff]  ;;  %88 = vst.msk [vmem:[#allocation2 + $0x49] sm:$0xff] %vm83_vm0, %v72_v35  ;;  %v75_v47 = vmax.f32 %v46_v37, %v245_v33  ;;  %v49_v49 = vmax.f32 %v246_v39, %v234_v44  ;;  %v249_v51 = vld [vmem:[%s428_s0 + $0xd8] sm:$0xff]  ;;  %v236_v52 = vld [vmem:[%s428_s0 + $0xe0] sm:$0xff] }
   0xc   :  { %89 = vst.msk [vmem:[#allocation2 + $0x51] sm:$0xff] %vm83_vm0, %v73_v36  ;;  %v76_v48 = vmax.f32 %v47_v38, %v246_v39  ;;  %v50_v50 = vmax.f32 %v247_v41, %v235_v46  ;;  %v250_v53 = vld [vmem:[%s428_s0 + $0xf0] sm:$0xff]  ;;  %90 = vst.msk [vmem:[#allocation2 + $0x61] sm:$0xff] %vm83_vm0, %v74_v42  ;;  %v77_v54 = vmax.f32 %v48_v43, %v247_v41  ;;  %v237_v56 = vld [vmem:[%s428_s0 + $0xe8] sm:$0xff] }
   0xd   :  { %v51_v55 = vmax.f32 %v248_v45, %v236_v52  ;;  %v251_v57 = vld [vmem:[%s428_s0 + $0xf8] sm:$0xff] }
   0xe   :  { %6 = vsyncpa [#allocation4], 0  ;;  %91 = vst.msk [vmem:[#allocation2 + $0x69] sm:$0xff] %vm83_vm0, %v75_v47  ;;  %v78_v58 = vmax.f32 %v49_v49, %v248_v45  ;;  %v79_v59 = vmax.f32 %v50_v50, %v249_v51  ;;  %v52_v60 = vmax.f32 %v249_v51, %v237_v56  ;;  %v123_v61 = vld [vmem:[#allocation2] ss:$2 sm:$0xff]  ;;  %s283_s0 = smov [#allocation3]  }
   0xf   :  { %92 = vst.msk [vmem:[#allocation2 + $0x79] sm:$0xff] %vm83_vm0, %v76_v48  ;;  %v139_v62 = vld [vmem:[#allocation2 + $0x1] ss:$2 sm:$0xff]  ;;  %v163_v63 = vld [vmem:[#allocation2 + $0x2] ss:$2 sm:$0xff]  ;;  %93 = vst.msk [vmem:[#allocation2 + $0x81] sm:$0xff] %vm83_vm0, %v77_v54  ;;  %v80_v0 = vmax.f32 %v51_v55, %v250_v53 }
  0x10   :  { %v154_v1 = vmax.f32 %v123_v61, %v139_v62  ;;  %94 = vst.msk [vmem:[#allocation2 + $0x91] sm:$0xff] %vm83_vm0, %v78_v58  ;;  %95 = vst.msk [vmem:[#allocation2 + $0x99] sm:$0xff] %vm83_vm0, %v79_v59  ;;  %v81_v2 = vmax.f32 %v52_v60, %v251_v57  ;;  %v125_v4 = vld [vmem:[#allocation2 + $0x18] ss:$2 sm:$0xff]  ;;  %v141_v5 = vld [vmem:[#allocation2 + $0x19] ss:$2 sm:$0xff] }
  0x11   :  { %96 = vst.msk [vmem:[#allocation2 + $0xa9] sm:$0xff] %vm83_vm0, %v80_v0  ;;  %v155_v6 = vmax.f32 %v125_v4, %v141_v5  ;;  %v127_v7 = vld [vmem:[#allocation2 + $0x30] ss:$2 sm:$0xff]  ;;  %v143_v8 = vld [vmem:[#allocation2 + $0x31] ss:$2 sm:$0xff]  ;;  %s199_s12 = sshll.u32 %s283_s0, 4  ;;  %s200_s12 = int_to_ptr.vmem [resolvable:$true] %s199_s12 }
  0x12   :  { %v178_v3 = vmax.f32 %v154_v1, %v163_v63  ;;  %97 = vst.msk [vmem:[#allocation2 + $0xb1] sm:$0xff] %vm83_vm0, %v81_v2  ;;  %v165_v9 = vld [vmem:[#allocation2 + $0x1a] ss:$2 sm:$0xff]  ;;  %v156_v10 = vmax.f32 %v127_v7, %v143_v8  ;;  %s258_s13 = scalar_lea.vmem %s200_s12, 1024  ;;  %p263_p1 = scmp.lt.s32.totalorder %s200_s12, %s200_s12 }
  0x13   :  { %v129_v11 = vld [vmem:[#allocation2 + $0x48] ss:$2 sm:$0xff]  ;;  %v145_v12 = vld [vmem:[#allocation2 + $0x49] ss:$2 sm:$0xff]  ;;  %v179_v13 = vmax.f32 %v155_v6, %v165_v9  ;;  %p259_p0 = scmp.ne.s32.totalorder %s200_s12, %s258_s13  ;;  %p264_p2 = scmp.lt.s32.totalorder %s258_s13, %s258_s13 }
  0x14   :  { %186 = vst.msk [vmem:[#allocation3] sm:$0xff] %vm83_vm0, %v178_v3  ;;  %v167_v14 = vld [vmem:[#allocation2 + $0x32] ss:$2 sm:$0xff]  ;;  %v157_v15 = vmax.f32 %v129_v11, %v145_v12 }
  0x15   :  { %v180_v16 = vmax.f32 %v156_v10, %v167_v14  ;;  %v169_v17 = vld [vmem:[#allocation2 + $0x4a] ss:$2 sm:$0xff]  ;;  %v147_v19 = vld [vmem:[#allocation2 + $0x61] ss:$2 sm:$0xff]  ;;  %187 = vst.msk [vmem:[#allocation3 + $0x8] sm:$0xff] %vm83_vm0, %v179_v13  ;;  %p265_p3 = por %p264_p2, %p263_p1 }
  0x16   :  { %v131_v18 = vld [vmem:[#allocation2 + $0x60] ss:$2 sm:$0xff]  ;;  %v181_v20 = vmax.f32 %v157_v15, %v169_v17  ;;  %v149_v23 = vld [vmem:[#allocation2 + $0x79] ss:$2 sm:$0xff] }
  0x17   :  { %v158_v21 = vmax.f32 %v131_v18, %v147_v19  ;;  %v133_v22 = vld [vmem:[#allocation2 + $0x78] ss:$2 sm:$0xff]  ;;  %188 = vst.msk [vmem:[#allocation3 + $0x10] sm:$0xff] %vm83_vm0, %v180_v16  ;;  %v151_v27 = vld [vmem:[#allocation2 + $0x91] ss:$2 sm:$0xff]  ;;  %p266_p4 = pnand %p265_p3, %p259_p0 }
  0x18   :  { %v171_v24 = vld [vmem:[#allocation2 + $0x62] ss:$2 sm:$0xff]  ;;  %v159_v25 = vmax.f32 %v133_v22, %v149_v23  ;;  %189 = vst.msk [vmem:[#allocation3 + $0x18] sm:$0xff] %vm83_vm0, %v181_v20  ;;  %v175_v32 = vld [vmem:[#allocation2 + $0x92] ss:$2 sm:$0xff] }
  0x19   :  { %v135_v26 = vld [vmem:[#allocation2 + $0x90] ss:$2 sm:$0xff]  ;;  %v182_v28 = vmax.f32 %v158_v21, %v171_v24  ;;  %v153_v34 = vld [vmem:[#allocation2 + $0xa9] ss:$2 sm:$0xff] }
  0x1a   :  { %v173_v29 = vld [vmem:[#allocation2 + $0x7a] ss:$2 sm:$0xff]  ;;  %v160_v30 = vmax.f32 %v135_v26, %v151_v27  ;;  %v177_v37 = vld [vmem:[#allocation2 + $0xaa] ss:$2 sm:$0xff] }
  0x1b   :  { %v183_v31 = vmax.f32 %v159_v25, %v173_v29  ;;  %v137_v33 = vld [vmem:[#allocation2 + $0xa8] ss:$2 sm:$0xff]  ;;  %190 = vst.msk [vmem:[#allocation3 + $0x20] sm:$0xff] %vm83_vm0, %v182_v28 }
  0x1c   :  { %v184_v35 = vmax.f32 %v160_v30, %v175_v32  ;;  %v161_v36 = vmax.f32 %v137_v33, %v153_v34 }
  0x1d   :  { %191 = vst.msk [vmem:[#allocation3 + $0x28] sm:$0xff] %vm83_vm0, %v183_v31 }
  0x1e   :  { %192 = vst.msk [vmem:[#allocation3 + $0x30] sm:$0xff] %vm83_vm0, %v184_v35  ;;  %v185_v38 = vmax.f32 %v161_v36, %v177_v37 }
  0x20   :  { %193 = vst.msk [vmem:[#allocation3 + $0x38] sm:$0xff] %vm83_vm0, %v185_v38 }
  0x21   :  { %269 = shalt.err (!%p266_p4)
}
  0x22   :  { %s270_s16 = scalar_lea.hbm %s429_s1, 1024 }
  0x23   :  { %p271_p5 = scmp.ne.s32.totalorder %s429_s1, %s270_s16  ;;  %p274_p6 = scmp.lt.u32.totalorder %s270_s16, %s429_s1 }
  0x25   :  { %p276_p7 = pnand %p274_p6, %p271_p5 }
  0x27   :  { %279 = shalt.err (!%p276_p7)
}
  0x28   :  { %s284_s21 = smov 128   ;;  %s285_s22 = smov 8  }
  0x29   :  { %205 = dma.vmem_to_hbm [thread:$0]  %s200_s12, 1024, %s429_s1, [#allocation4], %s284_s21, %s284_s21, %s285_s22  }
  0x2a   :  { %280 = dma.done.wait [#allocation4], 1024  }
  0x2b   :  { %281 = vsyncadd [#allocation4], 4294966272 }
  0x2c   :  { %209 = vsyncpa [#allocation4], 1 }

</bundles_post_ra>
